<compile_context>
chip_gen: v7x
topology: tpu7x:2x2x1
jax: 0.10.0
libtpu: 0.0.40
codegen_flags: <defaults>
</compile_context>

<pallas_src>
import functools

import jax
import jax.numpy as jnp
from jax import lax
from jax.experimental import pallas as pl
from jax.experimental.pallas import tpu as pltpu

_LANES = 128


def _cdiv(a, b):
    return -(-a // b)


def _round_up(a, b):
    return _cdiv(a, b) * b


def _neg_psnr(mse, max_pixel_value):
    # -psnr = -(20*log10(max/sqrt(mse))) = 10*log10(mse) - 20*log10(max)
    return (10.0 * jnp.log10(mse)
            - 20.0 * jnp.log10(jnp.float32(max_pixel_value)))


def _sse_kernel(o_ref, t_ref, out_ref, *, rows, row_tile, sub,
                tiles_per_shard, mask_from, num_virtual_tiles):
    """Accumulates per-lane/sublane squared-error partials into out_ref."""
    p = pl.program_id(0)
    i = pl.program_id(1)
    tile_idx = p * tiles_per_shard + i
    n_strips = row_tile // sub

    @pl.when(i == 0)
    def _():
        out_ref[...] = jnp.zeros_like(out_ref)

    def _partial_sse(masked):
        base_row = tile_idx * row_tile

        def strip(s, acc):
            r0 = pl.multiple_of(s * sub, sub)
            d = (o_ref[pl.ds(r0, sub), :].astype(jnp.float32)
                 - t_ref[pl.ds(r0, sub), :].astype(jnp.float32))
            if masked:
                row = (base_row + r0
                       + lax.broadcasted_iota(jnp.int32, (sub, _LANES), 0))
                d = jnp.where(row < rows, d, 0.0)
            sq = d * d
            # (sub, 128) -> (8, 128): pure vreg-wise VPU adds, no XLU reduce.
            return acc + sq.reshape(sub // 8, 8, _LANES).sum(axis=0)

        return lax.fori_loop(0, n_strips, strip,
                             jnp.zeros((8, _LANES), jnp.float32), unroll=True)

    if mask_from >= num_virtual_tiles:
        # No tile ever needs masking: single mask-free accumulation path.
        out_ref[...] += _partial_sse(False).reshape(1, 8, _LANES)
    else:
        @pl.when(tile_idx < mask_from)
        def _():
            out_ref[...] += _partial_sse(False).reshape(1, 8, _LANES)

        @pl.when(tile_idx >= mask_from)
        def _():
            out_ref[...] += _partial_sse(True).reshape(1, 8, _LANES)


def psnr_criterion(output, target, max_pixel_value=1.0, *, row_tile=4096,
                   min_kernel_elements=1 << 20, core_parallel=False):
    """Returns -PSNR(output, target), matching PSNRCriterion.forward."""
    assert output.shape == target.shape
    total = int(output.size)

    # Tiny inputs: launch/grid overhead dominates -> plain fused XLA.
    if total < max(int(min_kernel_elements), _LANES):
        diff = output.astype(jnp.float32) - target.astype(jnp.float32)
        return _neg_psnr(jnp.mean(diff * diff), max_pixel_value)

    o_flat = output.reshape(-1)   # free (bitcast) reshape, no dtype cast
    t_flat = target.reshape(-1)
    rows = total // _LANES
    main = rows * _LANES
    tail = total - main

    tail_sse = None
    if tail:
        # Ragged (<128-element) tail: tiny XLA reduction instead of a full
        # jnp.pad HBM copy of both inputs; kernel gets the 128-aligned prefix.
        ot = o_flat[main:].astype(jnp.float32)
        tt = t_flat[main:].astype(jnp.float32)
        tail_sse = jnp.sum((ot - tt) * (ot - tt))
        o_flat = o_flat[:main]
        t_flat = t_flat[:main]

    o2 = o_flat.reshape(rows, _LANES)
    t2 = t_flat.reshape(rows, _LANES)

    # Row tile: multiple of 8 sublanes, clamped to the (rounded-up) row count.
    row_tile = max(8, (int(row_tile) // 8) * 8)
    row_tile = min(row_tile, _round_up(rows, 8))
    # Strip size for the in-kernel strip-mined reduction (bounds VMEM temps).
    sub = next(c for c in (256, 128, 64, 32, 16, 8) if row_tile % c == 0)

    n_tiles = _cdiv(rows, row_tile)
    # Shard the tile loop across TensorCores whenever there are >= 2 tiles.
    # Odd tile counts get one duplicated overhang tile whose contribution is
    # fully masked out in the kernel (index_map clamps its DMA in-bounds).
    num_shards = 2 if n_tiles >= 2 else 1
    tiles_per_shard = _cdiv(n_tiles, num_shards)
    num_virtual_tiles = num_shards * tiles_per_shard
    mask_from = n_tiles - 1 if (rows % row_tile) else n_tiles

    kernel = functools.partial(
        _sse_kernel, rows=rows, row_tile=row_tile, sub=sub,
        tiles_per_shard=tiles_per_shard, mask_from=mask_from,
        num_virtual_tiles=num_virtual_tiles)

    def in_index_map(p, i):
        return (jnp.minimum(p * tiles_per_shard + i, n_tiles - 1), 0)

    itemsize = (jnp.dtype(output.dtype).itemsize
                + jnp.dtype(target.dtype).itemsize)
    cost = pl.CostEstimate(
        flops=3 * main, transcendentals=0,
        bytes_accessed=main * itemsize + num_shards * 8 * _LANES * 4)

    if core_parallel:
        # v7x experiment: force a true two-TensorCore split of the shard axis.
        dim_sem = (pltpu.CORE_PARALLEL, pltpu.ARBITRARY)
    else:
        dim_sem = ("parallel", "arbitrary")

    partials = pl.pallas_call(
        kernel,
        out_shape=jax.ShapeDtypeStruct((num_shards, 8, _LANES), jnp.float32),
        grid_spec=pltpu.PrefetchScalarGridSpec(
            num_scalar_prefetch=0,
            grid=(num_shards, tiles_per_shard),
            in_specs=[
                pl.BlockSpec((row_tile, _LANES), in_index_map),
                pl.BlockSpec((row_tile, _LANES), in_index_map),
            ],
            out_specs=pl.BlockSpec((1, 8, _LANES), lambda p, i: (p, 0, 0)),
        ),
        compiler_params=pltpu.CompilerParams(
            dimension_semantics=dim_sem,
            vmem_limit_bytes=32 * 1024 * 1024),
        cost_estimate=cost,
    )(o2, t2)

    # Tiny finalize on the partial sums (scalar-scale XLA work).
    sse = jnp.sum(partials, dtype=jnp.float32)
    if tail_sse is not None:
        sse = sse + tail_sse
    mse = sse / jnp.float32(total)
    return _neg_psnr(mse, max_pixel_value)


def _reference(x, y, max_pixel_value=1.0):
    mse = jnp.mean((x.astype(jnp.float32) - y.astype(jnp.float32)) ** 2)
    return -(20.0 * jnp.log10(max_pixel_value / jnp.sqrt(mse)))


if __name__ == "__main__":
    key = jax.random.PRNGKey(0)
    k1, k2, k3, k4, k5, k6 = jax.random.split(key, 6)

    # 1) Small NCHW demo shape (2048 elements, multiple of 128); force the
    #    Pallas kernel path (the auto heuristic would use the XLA fast path).
    x = jax.random.uniform(k1, (2, 4, 16, 16), dtype=jnp.float32)
    y = jax.random.uniform(k2, (2, 4, 16, 16), dtype=jnp.float32)
    loss = jax.block_until_ready(
        psnr_criterion(x, y, max_pixel_value=1.0, min_kernel_elements=0))
    ref = _reference(x, y)
    assert jnp.allclose(loss, ref, atol=1e-4, rtol=1e-4), (loss, ref)

    # 2) Ragged element count (1938, not a multiple of 128): exercises the
    #    XLA tail reduction + the in-kernel row mask on a partial block.
    xr = jax.random.uniform(k3, (2, 3, 17, 19), dtype=jnp.float32)
    yr = jax.random.uniform(k4, (2, 3, 17, 19), dtype=jnp.float32)
    loss_r = jax.block_until_ready(
        psnr_criterion(xr, yr, max_pixel_value=1.0, min_kernel_elements=0))
    ref_r = _reference(xr, yr)
    assert jnp.allclose(loss_r, ref_r, atol=1e-4, rtol=1e-4), (loss_r, ref_r)

    # 3) Odd tile count with a small row_tile: exercises the two-shard split,
    #    the clamped overhang tile and the partial last block.
    xs = jax.random.uniform(k5, (2, 4, 16, 40), dtype=jnp.float32)  # 5120 elem
    ys = jax.random.uniform(k6, (2, 4, 16, 40), dtype=jnp.float32)
    loss_s = jax.block_until_ready(
        psnr_criterion(xs, ys, max_pixel_value=1.0, row_tile=16,
                       min_kernel_elements=0))
    ref_s = _reference(xs, ys)
    assert jnp.allclose(loss_s, ref_s, atol=1e-4, rtol=1e-4), (loss_s, ref_s)

    # 4) Default heuristic on a tiny input: plain-XLA fast path.
    loss_auto = jax.block_until_ready(psnr_criterion(x, y))
    assert jnp.allclose(loss_auto, ref, atol=1e-4, rtol=1e-4), (loss_auto, ref)

    print("KERNEL_OK")
</pallas_src>

<mosaic_0001>
module attributes {stable_mosaic.version = 11 : i64} {
  func.func @_sse_kernel(%arg0: i32, %arg1: i32, %arg2: memref<16x128xf32, #tpu.memory_space<vmem>>, %arg3: memref<16x128xf32, #tpu.memory_space<vmem>>, %arg4: memref<1x8x128xf32, #tpu.memory_space<vmem>>) attributes {dimension_semantics = [#tpu.dimension_semantics<parallel>, #tpu.dimension_semantics<arbitrary>], iteration_bounds = array<i64: 1, 1>, scalar_prefetch = 0 : i64, scratch_operands = 0 : i64, tpu.core_type = #tpu.core_type<tc>, window_params = [{transform_indices = @transform_0, window_bounds = array<i64: 16, 128>}, {transform_indices = @transform_1, window_bounds = array<i64: 16, 128>}, {transform_indices = @transform_2, window_bounds = array<i64: 1, 8, 128>}]} {
    %c0_i32 = arith.constant 0 : i32
    %0 = arith.cmpi eq, %arg1, %c0_i32 : i32
    %1 = arith.extui %0 : i1 to i32
    %c0_i32_0 = arith.constant 0 : i32
    %2 = arith.cmpi ne, %1, %c0_i32_0 : i32
    scf.if %2 {
      %cst_10 = arith.constant 0.000000e+00 : f32
      %19 = vector.broadcast %cst_10 : f32 to vector<1x8x128xf32>
      %c0_11 = arith.constant 0 : index
      %c0_12 = arith.constant 0 : index
      %c0_13 = arith.constant 0 : index
      %20 = vector.load %arg4[%c0_11, %c0_12, %c0_13] : memref<1x8x128xf32, #tpu.memory_space<vmem>>, vector<1x8x128xf32>
      tpu.vector_store %arg4[%c0_11, %c0_12, %c0_13], %19 {strides = array<i32>} : memref<1x8x128xf32, #tpu.memory_space<vmem>>, vector<1x8x128xf32>,
    } else {
    }
    %c0 = arith.constant 0 : index
    %c0_1 = arith.constant 0 : index
    %c0_2 = arith.constant 0 : index
    %3 = vector.load %arg4[%c0, %c0_1, %c0_2] : memref<1x8x128xf32, #tpu.memory_space<vmem>>, vector<1x8x128xf32>
    %cst = arith.constant 0.000000e+00 : f32
    %4 = vector.broadcast %cst : f32 to vector<8x128xf32>
    %c0_i32_3 = arith.constant 0 : i32
    %c16_i32 = arith.constant 16 : i32
    %5 = arith.muli %c0_i32_3, %c16_i32 : i32
    %6 = tpu.assume_multiple %5, 16 : i32
    %7 = arith.index_cast %6 : i32 to index
    %c0_4 = arith.constant 0 : index
    %8 = vector.load %arg2[%7, %c0_4] : memref<16x128xf32, #tpu.memory_space<vmem>>, vector<16x128xf32>
    %9 = arith.index_cast %6 : i32 to index
    %c0_5 = arith.constant 0 : index
    %10 = vector.load %arg3[%9, %c0_5] : memref<16x128xf32, #tpu.memory_space<vmem>>, vector<16x128xf32>
    %11 = arith.subf %8, %10 : vector<16x128xf32>
    %12 = arith.mulf %11, %11 : vector<16x128xf32>
    %13 = vector.shape_cast %12 : vector<16x128xf32> to vector<2x8x128xf32>
    %cst_6 = arith.constant dense<0.000000e+00> : vector<8x128xf32>
    %14 = vector.multi_reduction <add>, %13, %cst_6 [0] : vector<2x8x128xf32> to vector<8x128xf32>
    %15 = arith.addf %4, %14 : vector<8x128xf32>
    %c1_i32 = arith.constant 1 : i32
    %16 = vector.shape_cast %15 : vector<8x128xf32> to vector<1x8x128xf32>
    %17 = arith.addf %3, %16 : vector<1x8x128xf32>
    %c0_7 = arith.constant 0 : index
    %c0_8 = arith.constant 0 : index
    %c0_9 = arith.constant 0 : index
    %18 = vector.load %arg4[%c0_7, %c0_8, %c0_9] : memref<1x8x128xf32, #tpu.memory_space<vmem>>, vector<1x8x128xf32>
    tpu.vector_store %arg4[%c0_7, %c0_8, %c0_9], %17 {strides = array<i32>} : memref<1x8x128xf32, #tpu.memory_space<vmem>>, vector<1x8x128xf32>,
    return
  }
  func.func @transform_0(%arg0: i32, %arg1: i32) -> (i32, i32) {
    %c1_i32 = arith.constant 1 : i32
    %0 = arith.muli %arg0, %c1_i32 : i32
    %1 = arith.addi %0, %arg1 : i32
    %c0_i32 = arith.constant 0 : i32
    %2 = arith.minsi %1, %c0_i32 : i32
    %c0_i32_0 = arith.constant 0 : i32
    %c0_i32_1 = arith.constant 0 : i32
    return %2, %c0_i32_0 : i32, i32
  }
  func.func @transform_1(%arg0: i32, %arg1: i32) -> (i32, i32) {
    %c1_i32 = arith.constant 1 : i32
    %0 = arith.muli %arg0, %c1_i32 : i32
    %1 = arith.addi %0, %arg1 : i32
    %c0_i32 = arith.constant 0 : i32
    %2 = arith.minsi %1, %c0_i32 : i32
    %c0_i32_0 = arith.constant 0 : i32
    %c0_i32_1 = arith.constant 0 : i32
    return %2, %c0_i32_0 : i32, i32
  }
  func.func @transform_2(%arg0: i32, %arg1: i32) -> (i32, i32, i32) {
    %c0_i32 = arith.constant 0 : i32
    %c0_i32_0 = arith.constant 0 : i32
    %c0_i32_1 = arith.constant 0 : i32
    return %arg0, %c0_i32, %c0_i32_0 : i32, i32, i32
  }
}

</mosaic_0001>

<bundles_post_ra>
// kernel: tpu_custom_call.1
= control target key start
LH: loop header
LB: loop body
LE: loop exit
PB: predicated region body
PF: predicated region fallthrough
CT: control target
= control target key end

     0   :  { %7 = vsyncpa [#allocation3], 0  ;;  %s232_s0 = inlined_call_operand.hbm [shape: f32[16,128], index: 0, kind: input, shape index: {}]   ;;  %s233_s1 = inlined_call_operand.hbm [shape: f32[16,128], index: 1, kind: input, shape index: {}]   ;;  %s234_s2 = inlined_call_operand.hbm [shape: f32[1,8,128], index: 2, kind: output, shape index: {}]  }
   0x1   :  { %8 = vsyncpa [#allocation6], 0 }
   0x2   :  { %9 = vsyncpa [#allocation4], 0  ;;  %s176_s9 = smov [#allocation2]   ;;  %s104_s13 = scalar_lea.hbm %s232_s0, 256 }
   0x3   :  { %s21_s10 = sshll.u32 %s176_s9, 4  ;;  %p105_p0 = scmp.ne.s32.totalorder %s232_s0, %s104_s13  ;;  %s22_s10 = int_to_ptr.vmem [resolvable:$true] %s21_s10 }
   0x4   :  { %p108_p1 = scmp.lt.u32.totalorder %s104_s13, %s232_s0 }
   0x6   :  { %p110_p2 = pnand %p108_p1, %p105_p0 }
   0x8   :  { %113 = shalt.err (!%p110_p2)
}
   0x9   :  { %s114_s18 = scalar_lea.vmem %s22_s10, 256  ;;  %p119_p4 = scmp.lt.s32.totalorder %s22_s10, %s22_s10 }
   0xa   :  { %p115_p3 = scmp.ne.s32.totalorder %s22_s10, %s114_s18  ;;  %p120_p5 = scmp.lt.s32.totalorder %s114_s18, %s114_s18 }
   0xc   :  { %p121_p6 = por %p120_p5, %p119_p4 }
   0xe   :  { %p122_p7 = pnand %p121_p6, %p115_p3 }
  0x10   :  { %125 = shalt.err (!%p122_p7)
}
  0x11   :  { %s177_s19 = smov 128   ;;  %s178_s20 = smov 8  }
  0x12   :  { %27 = dma.hbm_to_vmem [thread:$0]  %s232_s0, 256, %s22_s10, [#allocation3], %s177_s19, %s177_s19, %s178_s20  }
  0x13   :  { %s179_s23 = smov [#allocation5]   ;;  %s126_s27 = scalar_lea.hbm %s233_s1, 256 }
  0x14   :  { %s39_s24 = sshll.u32 %s179_s23, 4  ;;  %p127_p8 = scmp.ne.s32.totalorder %s233_s1, %s126_s27  ;;  %s40_s24 = int_to_ptr.vmem [resolvable:$true] %s39_s24 }
  0x15   :  { %p130_p9 = scmp.lt.u32.totalorder %s126_s27, %s233_s1 }
  0x17   :  { %p132_p10 = pnand %p130_p9, %p127_p8 }
  0x19   :  { %135 = shalt.err (!%p132_p10)
}
  0x1a   :  { %s136_s4 = scalar_lea.vmem %s40_s24, 256  ;;  %p141_p12 = scmp.lt.s32.totalorder %s40_s24, %s40_s24 }
  0x1b   :  { %p137_p11 = scmp.ne.s32.totalorder %s40_s24, %s136_s4  ;;  %p142_p13 = scmp.lt.s32.totalorder %s136_s4, %s136_s4 }
  0x1d   :  { %p143_p0 = por %p142_p13, %p141_p12 }
  0x1f   :  { %p144_p1 = pnand %p143_p0, %p137_p11 }
  0x21   :  { %147 = shalt.err (!%p144_p1)
}
  0x22   :  { %45 = dma.hbm_to_vmem [thread:$0]  %s233_s1, 256, %s40_s24, [#allocation6], %s177_s19, %s177_s19, %s178_s20  }
  0x23   :  { %170 = dma.done.wait [#allocation3], 256  }
  0x24   :  { %171 = vsyncadd [#allocation3], 4294967040 }
  0x25   :  { %172 = dma.done.wait [#allocation6], 256  }
  0x26   :  { %173 = vsyncadd [#allocation6], 4294967040  ;;  %v66_v0 = vld [vmem:[#allocation2] sm:$0xff]  ;;  %v67_v1 = vld [vmem:[#allocation2 + $0x8] sm:$0xff]  ;;  %s180_s6 = smov [#allocation7]  }
  0x27   :  { %v68_v2 = vld [vmem:[#allocation5] sm:$0xff]  ;;  %v69_v3 = vld [vmem:[#allocation5 + $0x8] sm:$0xff]  ;;  %s84_s7 = sshll.u32 %s180_s6, 4  ;;  %s85_s7 = int_to_ptr.vmem [resolvable:$true] %s84_s7 }
  0x28   :  { %v70_v4 = vsub.f32 %v66_v0, %v68_v2  ;;  %v71_v5 = vsub.f32 %v67_v1, %v69_v3  ;;  %s148_s8 = scalar_lea.vmem %s85_s7, 128  ;;  %p153_p3 = scmp.lt.s32.totalorder %s85_s7, %s85_s7 }
  0x29   :  { %p149_p2 = scmp.ne.s32.totalorder %s85_s7, %s148_s8  ;;  %p154_p4 = scmp.lt.s32.totalorder %s148_s8, %s148_s8 }
  0x2a   :  { %v72_v6 = vmul.f32 %v70_v4, %v70_v4  ;;  %v73_v7 = vmul.f32 %v71_v5, %v71_v5 }
  0x2b   :  { %p155_p5 = por %p154_p4, %p153_p3 }
  0x2c   :  { %v74_v8 = vadd.f32 %v73_v7, %v72_v6 }
  0x2d   :  { %p156_p6 = pnand %p155_p5, %p149_p2 }
  0x2e   :  { %77 = vst [vmem:[#allocation7] sm:$0xff] %v74_v8 }
  0x2f   :  { %159 = shalt.err (!%p156_p6)
}
  0x30   :  { %s160_s10 = scalar_lea.hbm %s234_s2, 128 }
  0x31   :  { %p161_p7 = scmp.ne.s32.totalorder %s234_s2, %s160_s10  ;;  %p164_p8 = scmp.lt.u32.totalorder %s160_s10, %s234_s2 }
  0x33   :  { %p166_p9 = pnand %p164_p8, %p161_p7 }
  0x35   :  { %169 = shalt.err (!%p166_p9)
}
  0x36   :  { %87 = dma.vmem_to_hbm [thread:$0]  %s85_s7, 128, %s234_s2, [#allocation4]  }
  0x37   :  { %174 = dma.done.wait [#allocation4], 128  }
  0x38   :  { %175 = vsyncadd [#allocation4], 4294967168 }
  0x39   :  { %91 = vsyncpa [#allocation3], 1 }
  0x3a   :  { %92 = vsyncpa [#allocation6], 1 }
  0x3b   :  { %93 = vsyncpa [#allocation4], 1 }

</bundles_post_ra>
